<compile_context>
chip_gen: v7x
topology: tpu7x:2x2x1
jax: 0.10.0
libtpu: 0.0.40
codegen_flags: <defaults>
</compile_context>

<pallas_src>
import numpy as np
import jax
import jax.numpy as jnp
from jax.experimental import pallas as pl
from jax.experimental.pallas import tpu as pltpu

_COS_EPS = 1e-8
_OUT_PAD = 128   # lane-dense output width; the 3 similarities live in cols 0..2
_N_SIMS = 3


def _round_up(x, m):
  return ((x + m - 1) // m) * m


def _cosine(dot_xy, sq_x, sq_y):
  # torch.nn.CosineSimilarity(dim=-1): x.y / max(||x||_2 * ||y||_2, eps)
  denom = jnp.maximum(jnp.sqrt(sq_x) * jnp.sqrt(sq_y), _COS_EPS)
  return dot_xy * pl.reciprocal(denom, approx=True)


# ---------------------------------- Pallas kernel ----------------------------------

def _similarity_fuser_kernel(img_ref, txt_ref, w_ref, b_ref, out_ref):
  img = img_ref[...]
  txt = txt_ref[...]

  # proj(txt * img): one MXU matmul per batch tile; W/b are grid-invariant and
  # stay resident in VMEM across all batch tiles.
  p = jnp.dot(txt * img, w_ref[...], preferred_element_type=jnp.float32) + b_ref[...]

  # Per-row reductions (XLU) for the three pairwise cosine similarities.
  sq_p   = jnp.sum(p * p,     axis=-1, keepdims=True)
  sq_img = jnp.sum(img * img, axis=-1, keepdims=True)
  sq_txt = jnp.sum(txt * txt, axis=-1, keepdims=True)
  dot_tp = jnp.sum(txt * p,   axis=-1, keepdims=True)
  dot_ip = jnp.sum(img * p,   axis=-1, keepdims=True)
  dot_it = jnp.sum(img * txt, axis=-1, keepdims=True)

  # sim_pairs = [(1,0), (2,0), (2,1)] over all_embs = [proj, txt, img]
  s0 = _cosine(dot_tp, sq_txt, sq_p)    # cs(txt, proj(txt*img))
  s1 = _cosine(dot_ip, sq_img, sq_p)    # cs(img, proj(txt*img))
  s2 = _cosine(dot_it, sq_img, sq_txt)  # cs(img, txt)

  # Lane-dense (TILE_B, 128) store built from pure VPU selects (no lane scatter,
  # no masked partial stores).  Columns >= 3 are zero and sliced off outside.
  col = jax.lax.broadcasted_iota(jnp.int32, out_ref.shape, 1)
  out_ref[...] = jnp.where(col == 0, s0,
                  jnp.where(col == 1, s1,
                   jnp.where(col == 2, s2, 0.0)))


# ------------------------------------- wrapper -------------------------------------

def similarity_fuser(img, txt, w, b, *, tile_b=128):
  """img, txt: (batch, hidden) f32.  w: (hidden, hidden).  b: (1, hidden)."""
  bs, hidden = img.shape
  tile_b = min(tile_b, _round_up(bs, 8))          # keep sublane-aligned tiles
  padded_bs = _round_up(bs, tile_b)
  if padded_bs != bs:
    pad = padded_bs - bs
    img = jnp.pad(img, ((0, pad), (0, 0)))
    txt = jnp.pad(txt, ((0, pad), (0, 0)))

  out = pl.pallas_call(
      _similarity_fuser_kernel,
      grid=(padded_bs // tile_b,),
      in_specs=[
          pl.BlockSpec((tile_b, hidden), lambda i: (i, 0)),   # img tile
          pl.BlockSpec((tile_b, hidden), lambda i: (i, 0)),   # txt tile
          pl.BlockSpec((hidden, hidden), lambda i: (0, 0)),   # proj weight (resident)
          pl.BlockSpec((1, hidden),      lambda i: (0, 0)),   # proj bias   (resident)
      ],
      out_specs=pl.BlockSpec((tile_b, _OUT_PAD), lambda i: (i, 0)),
      out_shape=jax.ShapeDtypeStruct((padded_bs, _OUT_PAD), jnp.float32),
      compiler_params=pltpu.CompilerParams(
          dimension_semantics=("parallel",)),                 # batch axis -> megacore
  )(img, txt, w, b)

  return out[:bs, :_N_SIMS]


# -------------------------------- params & reference --------------------------------

def init_params(key, hidden_dim):
  kw, kb = jax.random.split(key)
  bound = 1.0 / np.sqrt(hidden_dim)
  w = jax.random.uniform(kw, (hidden_dim, hidden_dim), jnp.float32, -bound, bound)
  b = jax.random.uniform(kb, (1, hidden_dim), jnp.float32, -bound, bound)
  return w, b


def similarity_fuser_reference(img, txt, w, b):
  p = (txt * img) @ w + b

  def cos(x, y):
    num = jnp.sum(x * y, axis=-1)
    den = jnp.maximum(jnp.linalg.norm(x, axis=-1) * jnp.linalg.norm(y, axis=-1),
                      _COS_EPS)
    return num / den

  return jnp.stack([cos(txt, p), cos(img, p), cos(img, txt)], axis=-1)


# --------------------------------------- demo ---------------------------------------

if __name__ == "__main__":
  key = jax.random.PRNGKey(0)

  # Small case consistent with the module: batch=2, hidden=32 (single batch tile).
  k_img, k_txt, k_par, k2_img, k2_txt, k2_par = jax.random.split(key, 6)
  bs, hidden = 2, 32
  img = jax.random.normal(k_img, (bs, hidden), jnp.float32)
  txt = jax.random.normal(k_txt, (bs, hidden), jnp.float32)
  w, b = init_params(k_par, hidden)

  out = jax.block_until_ready(similarity_fuser(img, txt, w, b))
  ref = similarity_fuser_reference(img, txt, w, b)
  np.testing.assert_allclose(np.asarray(out), np.asarray(ref), rtol=1e-2, atol=1e-2)

  # Multi-tile case: exercises the batch-tiled, pipelined, parallel-grid path.
  bs2, hidden2 = 300, 128
  img2 = jax.random.normal(k2_img, (bs2, hidden2), jnp.float32)
  txt2 = jax.random.normal(k2_txt, (bs2, hidden2), jnp.float32)
  w2, b2 = init_params(k2_par, hidden2)

  out2 = jax.block_until_ready(similarity_fuser(img2, txt2, w2, b2, tile_b=128))
  ref2 = similarity_fuser_reference(img2, txt2, w2, b2)
  np.testing.assert_allclose(np.asarray(out2), np.asarray(ref2), rtol=1e-2, atol=1e-2)

  print("KERNEL_OK")
</pallas_src>

<mosaic_0001>
module attributes {stable_mosaic.version = 11 : i64} {
  func.func @_similarity_fuser_kernel(%arg0: i32, %arg1: memref<8x32xf32, #tpu.memory_space<vmem>>, %arg2: memref<8x32xf32, #tpu.memory_space<vmem>>, %arg3: memref<32x32xf32, #tpu.memory_space<vmem>>, %arg4: memref<1x32xf32, #tpu.memory_space<vmem>>, %arg5: memref<8x128xf32, #tpu.memory_space<vmem>>) attributes {dimension_semantics = [#tpu.dimension_semantics<parallel>], iteration_bounds = array<i64: 1>, scalar_prefetch = 0 : i64, scratch_operands = 0 : i64, tpu.core_type = #tpu.core_type<tc>, window_params = [{transform_indices = @transform_0, window_bounds = array<i64: 8, 32>}, {transform_indices = @transform_1, window_bounds = array<i64: 8, 32>}, {pipeline_mode = #tpu.pipeline_mode<synchronous>, transform_indices = @transform_2, window_bounds = array<i64: 32, 32>}, {pipeline_mode = #tpu.pipeline_mode<synchronous>, transform_indices = @transform_3, window_bounds = array<i64: 1, 32>}, {transform_indices = @transform_4, window_bounds = array<i64: 8, 128>}]} {
    %c0 = arith.constant 0 : index
    %c0_0 = arith.constant 0 : index
    %0 = vector.load %arg1[%c0, %c0_0] : memref<8x32xf32, #tpu.memory_space<vmem>>, vector<8x32xf32>
    %c0_1 = arith.constant 0 : index
    %c0_2 = arith.constant 0 : index
    %1 = vector.load %arg2[%c0_1, %c0_2] : memref<8x32xf32, #tpu.memory_space<vmem>>, vector<8x32xf32>
    %2 = arith.mulf %1, %0 : vector<8x32xf32>
    %c0_3 = arith.constant 0 : index
    %c0_4 = arith.constant 0 : index
    %3 = vector.load %arg3[%c0_3, %c0_4] : memref<32x32xf32, #tpu.memory_space<vmem>>, vector<32x32xf32>
    %cst = arith.constant dense<0.000000e+00> : vector<8x32xf32>
    %4 = tpu.matmul %2, %3, %cst {dimension_numbers = #tpu.dot_dimension_numbers<[1], [0], [0], [1], [0, 0, 1, 1], [], []>} : vector<8x32xf32>, vector<32x32xf32>, vector<8x32xf32> -> vector<8x32xf32>
    %c0_5 = arith.constant 0 : index
    %c0_6 = arith.constant 0 : index
    %5 = vector.load %arg4[%c0_5, %c0_6] : memref<1x32xf32, #tpu.memory_space<vmem>>, vector<1x32xf32>
    %6 = vector.broadcast %5 : vector<1x32xf32> to vector<8x32xf32>
    %7 = arith.addf %4, %6 : vector<8x32xf32>
    %8 = arith.mulf %7, %7 : vector<8x32xf32>
    %cst_7 = arith.constant dense<0.000000e+00> : vector<8xf32>
    %9 = vector.multi_reduction <add>, %8, %cst_7 [1] : vector<8x32xf32> to vector<8xf32>
    %10 = vector.shape_cast %9 : vector<8xf32> to vector<8x1xf32>
    %11 = arith.mulf %0, %0 : vector<8x32xf32>
    %cst_8 = arith.constant dense<0.000000e+00> : vector<8xf32>
    %12 = vector.multi_reduction <add>, %11, %cst_8 [1] : vector<8x32xf32> to vector<8xf32>
    %13 = vector.shape_cast %12 : vector<8xf32> to vector<8x1xf32>
    %14 = arith.mulf %1, %1 : vector<8x32xf32>
    %cst_9 = arith.constant dense<0.000000e+00> : vector<8xf32>
    %15 = vector.multi_reduction <add>, %14, %cst_9 [1] : vector<8x32xf32> to vector<8xf32>
    %16 = vector.shape_cast %15 : vector<8xf32> to vector<8x1xf32>
    %17 = arith.mulf %1, %7 : vector<8x32xf32>
    %cst_10 = arith.constant dense<0.000000e+00> : vector<8xf32>
    %18 = vector.multi_reduction <add>, %17, %cst_10 [1] : vector<8x32xf32> to vector<8xf32>
    %19 = vector.shape_cast %18 : vector<8xf32> to vector<8x1xf32>
    %20 = arith.mulf %0, %7 : vector<8x32xf32>
    %cst_11 = arith.constant dense<0.000000e+00> : vector<8xf32>
    %21 = vector.multi_reduction <add>, %20, %cst_11 [1] : vector<8x32xf32> to vector<8xf32>
    %22 = vector.shape_cast %21 : vector<8xf32> to vector<8x1xf32>
    %23 = arith.mulf %0, %1 : vector<8x32xf32>
    %cst_12 = arith.constant dense<0.000000e+00> : vector<8xf32>
    %24 = vector.multi_reduction <add>, %23, %cst_12 [1] : vector<8x32xf32> to vector<8xf32>
    %25 = vector.shape_cast %24 : vector<8xf32> to vector<8x1xf32>
    %26 = math.sqrt %16 : vector<8x1xf32>
    %27 = math.sqrt %10 : vector<8x1xf32>
    %28 = arith.mulf %26, %27 : vector<8x1xf32>
    %cst_13 = arith.constant 9.99999993E-9 : f32
    %29 = vector.broadcast %cst_13 : f32 to vector<8x1xf32>
    %30 = arith.maximumf %28, %29 : vector<8x1xf32>
    %31 = tpu.reciprocal %30 {approx = true} : vector<8x1xf32> -> vector<8x1xf32>
    %32 = arith.mulf %19, %31 : vector<8x1xf32>
    %33 = math.sqrt %13 : vector<8x1xf32>
    %34 = math.sqrt %10 : vector<8x1xf32>
    %35 = arith.mulf %33, %34 : vector<8x1xf32>
    %cst_14 = arith.constant 9.99999993E-9 : f32
    %36 = vector.broadcast %cst_14 : f32 to vector<8x1xf32>
    %37 = arith.maximumf %35, %36 : vector<8x1xf32>
    %38 = tpu.reciprocal %37 {approx = true} : vector<8x1xf32> -> vector<8x1xf32>
    %39 = arith.mulf %22, %38 : vector<8x1xf32>
    %40 = math.sqrt %13 : vector<8x1xf32>
    %41 = math.sqrt %16 : vector<8x1xf32>
    %42 = arith.mulf %40, %41 : vector<8x1xf32>
    %cst_15 = arith.constant 9.99999993E-9 : f32
    %43 = vector.broadcast %cst_15 : f32 to vector<8x1xf32>
    %44 = arith.maximumf %42, %43 : vector<8x1xf32>
    %45 = tpu.reciprocal %44 {approx = true} : vector<8x1xf32> -> vector<8x1xf32>
    %46 = arith.mulf %25, %45 : vector<8x1xf32>
    %47 = tpu.iota {dimensions = array<i32: 1>} : vector<8x128xi32>
    %c0_i32 = arith.constant 0 : i32
    %48 = vector.broadcast %c0_i32 : i32 to vector<8x128xi32>
    %49 = arith.cmpi eq, %47, %48 : vector<8x128xi32>
    %c1_i32 = arith.constant 1 : i32
    %50 = vector.broadcast %c1_i32 : i32 to vector<8x128xi32>
    %51 = arith.cmpi eq, %47, %50 : vector<8x128xi32>
    %c2_i32 = arith.constant 2 : i32
    %52 = vector.broadcast %c2_i32 : i32 to vector<8x128xi32>
    %53 = arith.cmpi eq, %47, %52 : vector<8x128xi32>
    %cst_16 = arith.constant 0.000000e+00 : f32
    %54 = vector.shape_cast %46 : vector<8x1xf32> to vector<8x1xf32>
    %55 = vector.broadcast %54 : vector<8x1xf32> to vector<8x128xf32>
    %56 = vector.broadcast %cst_16 : f32 to vector<8x128xf32>
    %57 = arith.select %53, %55, %56 : vector<8x128xi1>, vector<8x128xf32>
    %58 = vector.shape_cast %39 : vector<8x1xf32> to vector<8x1xf32>
    %59 = vector.broadcast %58 : vector<8x1xf32> to vector<8x128xf32>
    %60 = arith.select %51, %59, %57 : vector<8x128xi1>, vector<8x128xf32>
    %61 = vector.shape_cast %32 : vector<8x1xf32> to vector<8x1xf32>
    %62 = vector.broadcast %61 : vector<8x1xf32> to vector<8x128xf32>
    %63 = arith.select %49, %62, %60 : vector<8x128xi1>, vector<8x128xf32>
    %c0_17 = arith.constant 0 : index
    %c0_18 = arith.constant 0 : index
    %64 = vector.load %arg5[%c0_17, %c0_18] : memref<8x128xf32, #tpu.memory_space<vmem>>, vector<8x128xf32>
    tpu.vector_store %arg5[%c0_17, %c0_18], %63 {strides = array<i32>} : memref<8x128xf32, #tpu.memory_space<vmem>>, vector<8x128xf32>,
    return
  }
  func.func @transform_0(%arg0: i32) -> (i32, i32) {
    %c0_i32 = arith.constant 0 : i32
    %c0_i32_0 = arith.constant 0 : i32
    return %arg0, %c0_i32 : i32, i32
  }
  func.func @transform_1(%arg0: i32) -> (i32, i32) {
    %c0_i32 = arith.constant 0 : i32
    %c0_i32_0 = arith.constant 0 : i32
    return %arg0, %c0_i32 : i32, i32
  }
  func.func @transform_2(%arg0: i32) -> (i32, i32) {
    %c0_i32 = arith.constant 0 : i32
    %c0_i32_0 = arith.constant 0 : i32
    %c0_i32_1 = arith.constant 0 : i32
    return %c0_i32, %c0_i32_0 : i32, i32
  }
  func.func @transform_3(%arg0: i32) -> (i32, i32) {
    %c0_i32 = arith.constant 0 : i32
    %c0_i32_0 = arith.constant 0 : i32
    %c0_i32_1 = arith.constant 0 : i32
    return %c0_i32, %c0_i32_0 : i32, i32
  }
  func.func @transform_4(%arg0: i32) -> (i32, i32) {
    %c0_i32 = arith.constant 0 : i32
    %c0_i32_0 = arith.constant 0 : i32
    return %arg0, %c0_i32 : i32, i32
  }
}

</mosaic_0001>

<bundles_post_ra>
// kernel: tpu_custom_call.1
= control target key start
LH: loop header
LB: loop body
LE: loop exit
PB: predicated region body
PF: predicated region fallthrough
CT: control target
= control target key end

     0   :  { %9 = vsyncpa [#allocation3], 0  ;;  %s455_s0 = inlined_call_operand.hbm [shape: f32[8,32], index: 0, kind: input, shape index: {}]   ;;  %s456_s1 = inlined_call_operand.hbm [shape: f32[8,32], index: 1, kind: input, shape index: {}]   ;;  %s457_s2 = inlined_call_operand.hbm [shape: f32[32,32], index: 2, kind: input, shape index: {}]   ;;  %s458_s3 = inlined_call_operand.vmem [shape: f32[1,32], index: 3, kind: input, shape index: {}]   ;;  %s459_s4 = inlined_call_operand.hbm [shape: f32[8,128], index: 4, kind: output, shape index: {}]  }
   0x1   :  { %10 = vsyncpa [#allocation6], 0 }
   0x2   :  { %11 = vsyncpa [#allocation4], 0  ;;  %s363_s15 = smov [#allocation5]   ;;  %s364_s17 = smov [#allocation2]  }
   0x3   :  { %s28_s16 = sshll.u32 %s363_s15, 4  ;;  %s18_s18 = sshll.u32 %s364_s17, 4  ;;  %s29_s16 = int_to_ptr.vmem [resolvable:$true] %s28_s16  ;;  %s19_s18 = int_to_ptr.vmem [resolvable:$true] %s18_s18 }
   0x4   :  { %s269_s21 = scalar_lea.hbm %s456_s1, 128 }
   0x5   :  { %p270_p0 = scmp.ne.s32.totalorder %s456_s1, %s269_s21  ;;  %p273_p1 = scmp.lt.u32.totalorder %s269_s21, %s456_s1 }
   0x7   :  { %p275_p2 = pnand %p273_p1, %p270_p0 }
   0x9   :  { %278 = shalt.err (!%p275_p2)
}
   0xa   :  { %s279_s26 = scalar_lea.vmem %s29_s16, 128  ;;  %p284_p4 = scmp.lt.s32.totalorder %s29_s16, %s29_s16 }
   0xb   :  { %p280_p3 = scmp.ne.s32.totalorder %s29_s16, %s279_s26  ;;  %p285_p5 = scmp.lt.s32.totalorder %s279_s26, %s279_s26 }
   0xd   :  { %p286_p6 = por %p285_p5, %p284_p4 }
   0xf   :  { %p287_p7 = pnand %p286_p6, %p280_p3 }
  0x11   :  { %290 = shalt.err (!%p287_p7)
}
  0x12   :  { %31 = dma.hbm_to_vmem [thread:$0]  %s456_s1, 128, %s29_s16, [#allocation6]  }
  0x13   :  { %s291_s5 = scalar_lea.hbm %s455_s0, 128 }
  0x14   :  { %p292_p8 = scmp.ne.s32.totalorder %s455_s0, %s291_s5  ;;  %p295_p9 = scmp.lt.u32.totalorder %s291_s5, %s455_s0 }
  0x16   :  { %p297_p10 = pnand %p295_p9, %p292_p8 }
  0x18   :  { %300 = shalt.err (!%p297_p10)
}
  0x19   :  { %s301_s10 = scalar_lea.vmem %s19_s18, 128  ;;  %p306_p12 = scmp.lt.s32.totalorder %s19_s18, %s19_s18 }
  0x1a   :  { %p302_p11 = scmp.ne.s32.totalorder %s19_s18, %s301_s10  ;;  %p307_p13 = scmp.lt.s32.totalorder %s301_s10, %s301_s10 }
  0x1c   :  { %p308_p0 = por %p307_p13, %p306_p12 }
  0x1e   :  { %p309_p1 = pnand %p308_p0, %p302_p11 }
  0x20   :  { %312 = shalt.err (!%p309_p1)
}
  0x21   :  { %21 = dma.hbm_to_vmem [thread:$0]  %s455_s0, 128, %s19_s18, [#allocation3]  }
  0x22   :  { %s365_s12 = smov [#allocation7]   ;;  %s313_s16 = scalar_lea.hbm %s457_s2, 512 }
  0x23   :  { %s37_s13 = sshll.u32 %s365_s12, 4  ;;  %p314_p2 = scmp.ne.s32.totalorder %s457_s2, %s313_s16  ;;  %s38_s13 = int_to_ptr.vmem [resolvable:$true] %s37_s13 }
  0x24   :  { %p317_p3 = scmp.lt.u32.totalorder %s313_s16, %s457_s2 }
  0x26   :  { %p319_p4 = pnand %p317_p3, %p314_p2 }
  0x28   :  { %322 = shalt.err (!%p319_p4)
}
  0x29   :  { %s323_s22 = scalar_lea.vmem %s38_s13, 512  ;;  %p328_p6 = scmp.lt.s32.totalorder %s38_s13, %s38_s13 }
  0x2a   :  { %p324_p5 = scmp.ne.s32.totalorder %s38_s13, %s323_s22  ;;  %p329_p7 = scmp.lt.s32.totalorder %s323_s22, %s323_s22 }
  0x2c   :  { %p330_p8 = por %p329_p7, %p328_p6 }
  0x2e   :  { %p331_p9 = pnand %p330_p8, %p324_p5 }
  0x30   :  { %334 = shalt.err (!%p331_p9)
}
  0x31   :  { %s366_s0 = smov 128   ;;  %s367_s18 = smov 8  }
  0x32   :  { %43 = dma.hbm_to_vmem [thread:$0]  %s457_s2, 512, %s38_s13, [#allocation6], %s366_s0, %s366_s0, %s367_s18  }
  0x33   :  { %357 = dma.done.wait [#allocation3], 128  }
  0x34   :  { %358 = vsyncadd [#allocation3], 4294967168 }
  0x35   :  { %359 = dma.done.wait [#allocation6], 640  }
  0x36   :  { %360 = vsyncadd [#allocation6], 4294966656  ;;  %v368_v0 = vmov 0.0|0.0   ;;  %vm369_vm0 = vmmov 0   ;;  %v370_v1 = vmov 0.0   ;;  %v58_v2 = vld [vmem:[#allocation7] sm:$0xff]  ;;  %v199_v50 = vlaneseq }
  0x37   :  { %242 = vmatprep.subr.bf16.mxu0 %v368_v0  ;;  %239 = vmatprep.mubr.msk.f32.mxu0 %vm369_vm0, %v370_v1  ;;  %v59_v3 = vld [vmem:[#allocation7 + $0x8] sm:$0xff]  ;;  %v60_v4 = vld [vmem:[#allocation7 + $0x10] sm:$0xff]  ;;  %v61_v6 = vld [vmem:[#allocation7 + $0x18] sm:$0xff]  ;;  %vm69_vm1 = vcmask 261120  }
  0x38   :  { %v243_v5 = vpack.c.bf16 %v59_v3, %v58_v2  ;;  %v55_v7 = vld [vmem:[#allocation2] sm:$0xff]  ;;  %v56_v8 = vld [vmem:[#allocation5] sm:$0xff]  ;;  %v246_v11 = vpack.c.bf16 %v61_v6, %v60_v4  ;;  %v200_v52 = vand.u32 127, %v199_v50 }
  0x39   :  { %v147_v9 = vmul.f32 %v55_v7, %v55_v7  ;;  %v151_v10 = vmul.f32 %v56_v8, %v56_v8  ;;  %v57_v13 = vmul.f32 %v56_v8, %v55_v7  ;;  %v224_v15 = vld [vmem:[%s458_s3] ss:$0 sm:$0xff]  ;;  %s371_s3 = smov [#allocation8]  }
  0x3a   :  { %244 = vmatpush3.bf16.msra.mxu0 %v243_v5  ;;  %vm203_vm8 = vcmp.eq.s32.totalorder %v200_v52, 2  ;;  %vm202_vm9 = vcmp.eq.s32.totalorder %v200_v52, 1  ;;  %s214_s26 = sshll.u32 %s371_s3, 4  ;;  %vm201_vm10 = vcmp.eq.s32.totalorder %v200_v52, 0  ;;  %s215_s26 = int_to_ptr.vmem [resolvable:$true] %s214_s26 }
  0x3b   :  { %245 = vmatprep.subr.bf16.mxu0 %v368_v0  ;;  %v148_v12 = vsel %vm69_vm1, %v147_v9, 0.0  ;;  %v152_v14 = vsel %vm69_vm1, %v151_v10, 0.0  ;;  %v163_v23 = vsel %vm69_vm1, %v57_v13, 0.0  ;;  %s335_s27 = scalar_lea.vmem %s215_s26, 128  ;;  %p340_p11 = scmp.lt.s32.totalorder %s215_s26, %s215_s26 }
  0x3c   :  { %149 = vadd.xlane.f32.xlu0 %v148_v12  ;;  %p336_p10 = scmp.ne.s32.totalorder %s215_s26, %s335_s27  ;;  %p341_p12 = scmp.lt.s32.totalorder %s335_s27, %s335_s27 }
  0x3e   :  { %247 = vmatpush3.bf16.msra.mxu0 %v246_v11  ;;  %p342_p13 = por %p341_p12, %p340_p11 }
  0x40   :  { %153 = vadd.xlane.f32.xlu0 %v152_v14  ;;  %p343_p0 = pnand %p342_p13, %p336_p10 }
  0x41   :  { %240 = vmatmul.mubr.msk.f32.vlgmr.msra.gmra.mrb[0].mxu0 %vm69_vm1, %v57_v13 }
  0xc9   :  { %v150_v26 = vpop.xlane.xlu0 %149 }
  0xca   :  { %257 = vrsqrt.f32 %v150_v26  ;;  %vm186_vm2 = vcmp.eq.f32.partialorder %v150_v26, inf  ;;  %vm188_vm4 = vcmp.eq.f32.partialorder %v150_v26, 0.0  ;;  %v189_v32 = vand.u32 2147483648, %v150_v26 }
  0xcd   :  { %v154_v27 = vpop.xlane.xlu0 %153 }
  0xce   :  { %259 = vrsqrt.f32 %v154_v27  ;;  %vm168_vm3 = vcmp.eq.f32.partialorder %v154_v27, inf  ;;  %v171_v33 = vand.u32 2147483648, %v154_v27  ;;  %vm170_vm5 = vcmp.eq.f32.partialorder %v154_v27, 0.0 }
  0xd4   :  { %v258_v28 = vpop.eup %257 }
  0xd5   :  { %v185_v30 = vmul.f32 %v258_v28, %v150_v26 }
  0xd7   :  { %v187_v35 = vsel %vm186_vm2, %v150_v26, %v185_v30 }
  0xd8   :  { %v260_v29 = vpop.eup %259  ;;  %v190_v38 = vsel %vm188_vm4, %v189_v32, %v187_v35 }
  0xd9   :  { %v167_v31 = vmul.f32 %v260_v29, %v154_v27 }
  0xdb   :  { %v169_v36 = vsel %vm168_vm3, %v154_v27, %v167_v31 }
  0xdc   :  { %v172_v37 = vsel %vm170_vm5, %v171_v33, %v169_v36 }
  0xdd   :  { %v195_v39 = vmul.f32 %v190_v38, %v172_v37 }
  0xdf   :  { %v196_v41 = vmax.f32 %v195_v39, 1e-08 }
 0x114   :  { %v139_v16 = vpop.f32.mrb[0].mxu0 }
 0x115   :  { %v140_v17 = vadd.f32 %v224_v15, %v139_v16  ;;  %v241_v18 = vpop.f32.mrb[1].mxu0 }
 0x117   :  { %v159_v19 = vmul.f32 %v140_v17, %v55_v7  ;;  %v143_v20 = vmul.f32 %v140_v17, %v140_v17  ;;  %v155_v24 = vmul.f32 %v140_v17, %v56_v8 }
 0x119   :  { %v160_v21 = vsel %vm69_vm1, %v159_v19, 0.0  ;;  %v144_v22 = vsel %vm69_vm1, %v143_v20, 0.0  ;;  %v156_v25 = vsel %vm69_vm1, %v155_v24, 0.0 }
 0x11a   :  { %161 = vadd.xlane.f32.xlu0 %v160_v21  ;;  %145 = vadd.xlane.f32.xlu1 %v144_v22 }
 0x11e   :  { %164 = vadd.xlane.f32.xlu1 %v163_v23 }
 0x122   :  { %157 = vadd.xlane.f32.xlu1 %v156_v25 }
 0x1a7   :  { %v146_v34 = vpop.xlane.xlu1 %145  ;;  %v162_v56 = vpop.xlane.xlu0 %161 }
 0x1a8   :  { %261 = vrsqrt.f32 %v146_v34  ;;  %vm175_vm6 = vcmp.eq.f32.partialorder %v146_v34, inf  ;;  %v178_v43 = vand.u32 2147483648, %v146_v34  ;;  %vm177_vm7 = vcmp.eq.f32.partialorder %v146_v34, 0.0 }
 0x1a9   :  { %263 = vrcp.f32 %v196_v41 }
 0x1ab   :  { %v165_v53 = vpop.xlane.xlu1 %164 }
 0x1af   :  { %v158_v59 = vpop.xlane.xlu1 %157 }
 0x1b2   :  { %v262_v40 = vpop.eup %261 }
 0x1b3   :  { %v174_v42 = vmul.f32 %v262_v40, %v146_v34  ;;  %v264_v51 = vpop.eup %263 }
 0x1b4   :  { %v198_v54 = vmul.f32 %v264_v51, %v165_v53 }
 0x1b5   :  { %v176_v44 = vsel %vm175_vm6, %v146_v34, %v174_v42 }
 0x1b6   :  { %v179_v45 = vsel %vm177_vm7, %v178_v43, %v176_v44  ;;  %v204_v60 = vsel %vm203_vm8, %v198_v54, 0.0 }
 0x1b7   :  { %v191_v46 = vmul.f32 %v190_v38, %v179_v45  ;;  %v180_v47 = vmul.f32 %v179_v45, %v172_v37 }
 0x1b9   :  { %v192_v48 = vmax.f32 %v191_v46, 1e-08  ;;  %v181_v49 = vmax.f32 %v180_v47, 1e-08 }
 0x1bb   :  { %265 = vrcp.f32 %v192_v48 }
 0x1bc   :  { %267 = vrcp.f32 %v181_v49 }
 0x1c5   :  { %v266_v55 = vpop.eup %265 }
 0x1c6   :  { %v268_v57 = vpop.eup %267  ;;  %v194_v58 = vmul.f32 %v266_v55, %v162_v56 }
 0x1c7   :  { %v183_v61 = vmul.f32 %v268_v57, %v158_v59 }
 0x1c8   :  { %v205_v62 = vsel %vm202_vm9, %v194_v58, %v204_v60 }
 0x1c9   :  { %v206_v63 = vsel %vm201_vm10, %v183_v61, %v205_v62 }
 0x1ca   :  { %207 = vst [vmem:[#allocation8] sm:$0xff] %v206_v63 }
 0x1cb   :  { %346 = shalt.err (!%p343_p0)
}
 0x1cc   :  { %s347_s30 = scalar_lea.hbm %s459_s4, 128 }
 0x1cd   :  { %p348_p1 = scmp.ne.s32.totalorder %s459_s4, %s347_s30  ;;  %p351_p2 = scmp.lt.u32.totalorder %s347_s30, %s459_s4 }
 0x1cf   :  { %p353_p3 = pnand %p351_p2, %p348_p1 }
 0x1d1   :  { %356 = shalt.err (!%p353_p3)
}
 0x1d2   :  { %217 = dma.vmem_to_hbm [thread:$0]  %s215_s26, 128, %s459_s4, [#allocation4]  }
 0x1d3   :  { %361 = dma.done.wait [#allocation4], 128  }
 0x1d4   :  { %362 = vsyncadd [#allocation4], 4294967168 }
 0x1d5   :  { %221 = vsyncpa [#allocation3], 1 }
 0x1d6   :  { %222 = vsyncpa [#allocation6], 1 }
 0x1d7   :  { %223 = vsyncpa [#allocation4], 1 }

</bundles_post_ra>
